<compile_context>
chip_gen: v7x
topology: tpu7x:2x2x1
jax: 0.10.0
libtpu: 0.0.40
codegen_flags: <defaults>
</compile_context>

<pallas_src>
import jax
import jax.numpy as jnp
from jax import lax
from jax.experimental import pallas as pl
from jax.experimental.pallas import tpu as pltpu

LANE = 128


def _round_up(x, m):
    return ((x + m - 1) // m) * m


def _num_tensorcores():
    """TensorCores per chip (v7x = 2, v5e/v6e = 1). Used only for the grid clamp."""
    try:
        info = pltpu.get_tpu_info()
        for attr in ("num_cores", "num_tensorcores", "tensorcores_per_chip",
                     "cores_per_chip", "core_count"):
            v = getattr(info, attr, None)
            if isinstance(v, int) and v > 0:
                return v
    except Exception:
        pass
    try:
        v = getattr(jax.devices()[0], "num_cores", None)
        if isinstance(v, int) and v > 0:
            return v
    except Exception:
        pass
    return 1


def _choose_tile(N, tile_n, n_cores):
    """Batch tile: big (overhead-bound kernel), but keep >=2 steps per core on
    multi-core chips so BlockSpec double-buffering has something to overlap."""
    min_steps = 2 * n_cores if n_cores > 1 else 1
    cap = _round_up(pl.cdiv(N, min_steps), 8)
    t = min(tile_n, cap)
    t = max(8, (t // 8) * 8)            # multiple of 8 (sublane constraint)
    if t >= N:
        return N                        # single full-extent block (any N legal)
    return t


def _nngrow_kernel(feat_ref, x1_ref, x2_ref, w0f_ref, w0rib_ref,
                   w1_ref, b1_ref, w2_ref, b2_ref, out_ref):
    # --- input augmentation: r = ||x1 - x2||, 1/r ---
    dr = x1_ref[...] - x2_ref[...]                       # [tn, D]
    sumsq = jnp.sum(dr * dr, axis=1, keepdims=True)      # [tn, 1]
    inv_r = lax.rsqrt(sumsq)                             # 1/r  (single EUP op)
    r = sumsq * inv_r                                    # sqrt(sumsq) via VALU mul

    # --- layer 0: Linear(in_dim = F+2, H0) + ReLU ---
    # x @ W0 == feat @ W0[:F] + r * W0[F] + (1/r) * W0[F+1]  (+ b0)
    aug = w0rib_ref[...]                                 # [3, H0]: W0[F], W0[F+1], b0
    h = jnp.dot(feat_ref[...], w0f_ref[...], preferred_element_type=jnp.float32)
    h = h + r * aug[0:1, :] + inv_r * aug[1:2, :] + aug[2:3, :]
    h = jnp.maximum(h, 0.0)

    # --- layer 1: Linear(H0, H1) + ReLU ---
    # TODO(synk): training-mode Dropout(p=0.3) not applied; eval semantics used.
    h = jnp.dot(h, w1_ref[...], preferred_element_type=jnp.float32) + b1_ref[...]
    h = jnp.maximum(h, 0.0)

    # --- output layer: Linear(H1, out_dim) ---
    out_ref[...] = (jnp.dot(h, w2_ref[...], preferred_element_type=jnp.float32)
                    + b2_ref[...])


def nngrow_forward(features, x1, x2, params, *, tile_n=2048):
    """params = (w0 [in_dim, H0], b0 [1, H0], w1, b1, w2, b2), in_dim = F + 2."""
    N, F = features.shape
    D = x1.shape[1]
    w0, b0, w1, b1, w2, b2 = params
    in_dim, H0 = w0.shape
    assert in_dim == F + 2
    H1 = w1.shape[1]
    O = w2.shape[1]

    # Lane-dense padding only when out_dim is large AND not a multiple of 128;
    # tiny out_dim writes its natural width (16 B/row beats 512 B/row padded).
    if O >= LANE and O % LANE != 0:
        O_pad = _round_up(O, LANE)
        w2 = jnp.pad(w2, ((0, 0), (0, O_pad - O)))
        b2 = jnp.pad(b2, ((0, 0), (0, O_pad - O)))
    else:
        O_pad = O

    # Split W0 into feature rows and the stacked (r-row, 1/r-row, b0) block.
    w0f = w0[:F, :]                                       # [F, H0]
    w0rib = jnp.concatenate([w0[F:F + 2, :], b0], axis=0)  # [3, H0]

    tn = _choose_tile(N, tile_n, _num_tensorcores())
    grid = (pl.cdiv(N, tn),)

    row = lambda cols: pl.BlockSpec((tn, cols), lambda i: (i, 0))
    full = lambda shape: pl.BlockSpec(shape, lambda i: (0, 0))

    out = pl.pallas_call(
        _nngrow_kernel,
        out_shape=jax.ShapeDtypeStruct((N, O_pad), jnp.float32),
        grid_spec=pltpu.PrefetchScalarGridSpec(
            num_scalar_prefetch=0,
            grid=grid,
            in_specs=[
                row(F),                 # features
                row(D),                 # x1
                row(D),                 # x2
                full((F, H0)),          # W0 feature rows
                full((3, H0)),          # stacked [W0_r; W0_invr; b0]
                full((H0, H1)),         # W1
                full((1, H1)),          # b1
                full((H1, O_pad)),      # W2
                full((1, O_pad)),       # b2
            ],
            out_specs=pl.BlockSpec((tn, O_pad), lambda i: (i, 0)),
        ),
        compiler_params=pltpu.CompilerParams(
            dimension_semantics=("parallel",),
            vmem_limit_bytes=32 * 1024 * 1024,
        ),
        cost_estimate=pl.CostEstimate(
            flops=2 * N * (in_dim * H0 + H0 * H1 + H1 * O_pad),
            transcendentals=N,
            bytes_accessed=4 * (N * (F + 2 * D) + N * O_pad
                                + F * H0 + 3 * H0 + H0 * H1 + H1
                                + H1 * O_pad + O_pad),
        ),
    )(features, x1, x2, w0f, w0rib, w1, b1, w2, b2)

    return out if O_pad == O else out[:, :O]


def xavier_uniform(key, fan_in, fan_out):
    # matches torch.nn.init.xavier_uniform_ on an [out, in] weight; stored [in, out]
    limit = jnp.sqrt(6.0 / (fan_in + fan_out))
    return jax.random.uniform(key, (fan_in, fan_out), jnp.float32, -limit, limit)


def make_params(key, in_dim, hidden_dim, out_dim):
    k = jax.random.split(key, 6)
    H0, H1 = hidden_dim
    w0 = xavier_uniform(k[0], in_dim, H0)
    b0 = jax.random.uniform(k[1], (1, H0), jnp.float32, -0.1, 0.1)
    w1 = xavier_uniform(k[2], H0, H1)
    b1 = jax.random.uniform(k[3], (1, H1), jnp.float32, -0.1, 0.1)
    w2 = xavier_uniform(k[4], H1, out_dim)
    b2 = jax.random.uniform(k[5], (1, out_dim), jnp.float32, -0.1, 0.1)
    return (w0, b0, w1, b1, w2, b2)


def nngrow_reference(features, x1, x2, params):
    w0, b0, w1, b1, w2, b2 = params
    dr = x1 - x2
    r = jnp.sqrt(jnp.sum(dr * dr, axis=1, keepdims=True))
    x = jnp.concatenate([features, r, 1.0 / r], axis=1)
    h = jnp.maximum(x @ w0 + b0, 0.0)
    h = jnp.maximum(h @ w1 + b1, 0.0)
    return h @ w2 + b2


if __name__ == "__main__":
    key = jax.random.PRNGKey(0)
    N = 16          # batch
    F = 6           # raw feature dim  -> in_dim = F + 2 = 8
    D = 3           # coordinate dim for x1, x2
    hidden_dim = (32, 32)
    out_dim = 4

    kf, k1, k2, kp = jax.random.split(key, 4)
    features = jax.random.normal(kf, (N, F), jnp.float32)
    x1 = jax.random.normal(k1, (N, D), jnp.float32)
    x2 = jax.random.normal(k2, (N, D), jnp.float32) + 1.0  # keep r away from 0

    params = make_params(kp, F + 2, hidden_dim, out_dim)

    out = nngrow_forward(features, x1, x2, params)
    jax.block_until_ready(out)
    assert out.shape == (N, out_dim)

    ref = nngrow_reference(features, x1, x2, params)
    assert jnp.allclose(out, ref, atol=1e-4, rtol=1e-4), float(jnp.max(jnp.abs(out - ref)))

    print("KERNEL_OK")
</pallas_src>

<mosaic_0001>
module attributes {stable_mosaic.version = 11 : i64} {
  func.func @_nngrow_kernel(%arg0: i32, %arg1: memref<16x6xf32, #tpu.memory_space<vmem>>, %arg2: memref<16x3xf32, #tpu.memory_space<vmem>>, %arg3: memref<16x3xf32, #tpu.memory_space<vmem>>, %arg4: memref<6x32xf32, #tpu.memory_space<vmem>>, %arg5: memref<3x32xf32, #tpu.memory_space<vmem>>, %arg6: memref<32x32xf32, #tpu.memory_space<vmem>>, %arg7: memref<1x32xf32, #tpu.memory_space<vmem>>, %arg8: memref<32x4xf32, #tpu.memory_space<vmem>>, %arg9: memref<1x4xf32, #tpu.memory_space<vmem>>, %arg10: memref<16x4xf32, #tpu.memory_space<vmem>>) attributes {dimension_semantics = [#tpu.dimension_semantics<parallel>], iteration_bounds = array<i64: 1>, scalar_prefetch = 0 : i64, scratch_operands = 0 : i64, tpu.core_type = #tpu.core_type<tc>, window_params = [{transform_indices = @transform_0, window_bounds = array<i64: 16, 6>}, {transform_indices = @transform_1, window_bounds = array<i64: 16, 3>}, {transform_indices = @transform_2, window_bounds = array<i64: 16, 3>}, {pipeline_mode = #tpu.pipeline_mode<synchronous>, transform_indices = @transform_3, window_bounds = array<i64: 6, 32>}, {pipeline_mode = #tpu.pipeline_mode<synchronous>, transform_indices = @transform_4, window_bounds = array<i64: 3, 32>}, {pipeline_mode = #tpu.pipeline_mode<synchronous>, transform_indices = @transform_5, window_bounds = array<i64: 32, 32>}, {pipeline_mode = #tpu.pipeline_mode<synchronous>, transform_indices = @transform_6, window_bounds = array<i64: 1, 32>}, {pipeline_mode = #tpu.pipeline_mode<synchronous>, transform_indices = @transform_7, window_bounds = array<i64: 32, 4>}, {pipeline_mode = #tpu.pipeline_mode<synchronous>, transform_indices = @transform_8, window_bounds = array<i64: 1, 4>}, {transform_indices = @transform_9, window_bounds = array<i64: 16, 4>}]} {
    %c0 = arith.constant 0 : index
    %c0_0 = arith.constant 0 : index
    %0 = vector.load %arg2[%c0, %c0_0] : memref<16x3xf32, #tpu.memory_space<vmem>>, vector<16x3xf32>
    %c0_1 = arith.constant 0 : index
    %c0_2 = arith.constant 0 : index
    %1 = vector.load %arg3[%c0_1, %c0_2] : memref<16x3xf32, #tpu.memory_space<vmem>>, vector<16x3xf32>
    %2 = arith.subf %0, %1 : vector<16x3xf32>
    %3 = arith.mulf %2, %2 : vector<16x3xf32>
    %cst = arith.constant dense<0.000000e+00> : vector<16xf32>
    %4 = vector.multi_reduction <add>, %3, %cst [1] : vector<16x3xf32> to vector<16xf32>
    %5 = vector.shape_cast %4 : vector<16xf32> to vector<16x1xf32>
    %6 = math.rsqrt %5 : vector<16x1xf32>
    %7 = arith.mulf %5, %6 : vector<16x1xf32>
    %c0_3 = arith.constant 0 : index
    %c0_4 = arith.constant 0 : index
    %8 = vector.load %arg5[%c0_3, %c0_4] : memref<3x32xf32, #tpu.memory_space<vmem>>, vector<3x32xf32>
    %c0_5 = arith.constant 0 : index
    %c0_6 = arith.constant 0 : index
    %9 = vector.load %arg1[%c0_5, %c0_6] : memref<16x6xf32, #tpu.memory_space<vmem>>, vector<16x6xf32>
    %c0_7 = arith.constant 0 : index
    %c0_8 = arith.constant 0 : index
    %10 = vector.load %arg4[%c0_7, %c0_8] : memref<6x32xf32, #tpu.memory_space<vmem>>, vector<6x32xf32>
    %cst_9 = arith.constant dense<0.000000e+00> : vector<16x32xf32>
    %11 = tpu.matmul %9, %10, %cst_9 {dimension_numbers = #tpu.dot_dimension_numbers<[1], [0], [0], [1], [0, 0, 1, 1], [], []>} : vector<16x6xf32>, vector<6x32xf32>, vector<16x32xf32> -> vector<16x32xf32>
    %12 = vector.extract_strided_slice %8 {offsets = [0, 0], sizes = [1, 32], strides = [1, 1]} : vector<3x32xf32> to vector<1x32xf32>
    %13 = vector.broadcast %7 : vector<16x1xf32> to vector<16x32xf32>
    %14 = vector.broadcast %12 : vector<1x32xf32> to vector<16x32xf32>
    %15 = arith.mulf %13, %14 : vector<16x32xf32>
    %16 = arith.addf %11, %15 : vector<16x32xf32>
    %17 = vector.extract_strided_slice %8 {offsets = [1, 0], sizes = [1, 32], strides = [1, 1]} : vector<3x32xf32> to vector<1x32xf32>
    %18 = vector.broadcast %6 : vector<16x1xf32> to vector<16x32xf32>
    %19 = vector.broadcast %17 : vector<1x32xf32> to vector<16x32xf32>
    %20 = arith.mulf %18, %19 : vector<16x32xf32>
    %21 = arith.addf %16, %20 : vector<16x32xf32>
    %22 = vector.extract_strided_slice %8 {offsets = [2, 0], sizes = [1, 32], strides = [1, 1]} : vector<3x32xf32> to vector<1x32xf32>
    %23 = vector.broadcast %22 : vector<1x32xf32> to vector<16x32xf32>
    %24 = arith.addf %21, %23 : vector<16x32xf32>
    %cst_10 = arith.constant 0.000000e+00 : f32
    %25 = vector.broadcast %cst_10 : f32 to vector<16x32xf32>
    %26 = arith.maximumf %24, %25 : vector<16x32xf32>
    %c0_11 = arith.constant 0 : index
    %c0_12 = arith.constant 0 : index
    %27 = vector.load %arg6[%c0_11, %c0_12] : memref<32x32xf32, #tpu.memory_space<vmem>>, vector<32x32xf32>
    %cst_13 = arith.constant dense<0.000000e+00> : vector<16x32xf32>
    %28 = tpu.matmul %26, %27, %cst_13 {dimension_numbers = #tpu.dot_dimension_numbers<[1], [0], [0], [1], [0, 0, 1, 1], [], []>} : vector<16x32xf32>, vector<32x32xf32>, vector<16x32xf32> -> vector<16x32xf32>
    %c0_14 = arith.constant 0 : index
    %c0_15 = arith.constant 0 : index
    %29 = vector.load %arg7[%c0_14, %c0_15] : memref<1x32xf32, #tpu.memory_space<vmem>>, vector<1x32xf32>
    %30 = vector.broadcast %29 : vector<1x32xf32> to vector<16x32xf32>
    %31 = arith.addf %28, %30 : vector<16x32xf32>
    %cst_16 = arith.constant 0.000000e+00 : f32
    %32 = vector.broadcast %cst_16 : f32 to vector<16x32xf32>
    %33 = arith.maximumf %31, %32 : vector<16x32xf32>
    %c0_17 = arith.constant 0 : index
    %c0_18 = arith.constant 0 : index
    %34 = vector.load %arg8[%c0_17, %c0_18] : memref<32x4xf32, #tpu.memory_space<vmem>>, vector<32x4xf32>
    %cst_19 = arith.constant dense<0.000000e+00> : vector<16x4xf32>
    %35 = tpu.matmul %33, %34, %cst_19 {dimension_numbers = #tpu.dot_dimension_numbers<[1], [0], [0], [1], [0, 0, 1, 1], [], []>} : vector<16x32xf32>, vector<32x4xf32>, vector<16x4xf32> -> vector<16x4xf32>
    %c0_20 = arith.constant 0 : index
    %c0_21 = arith.constant 0 : index
    %36 = vector.load %arg9[%c0_20, %c0_21] : memref<1x4xf32, #tpu.memory_space<vmem>>, vector<1x4xf32>
    %37 = vector.broadcast %36 : vector<1x4xf32> to vector<16x4xf32>
    %38 = arith.addf %35, %37 : vector<16x4xf32>
    %c0_22 = arith.constant 0 : index
    %c0_23 = arith.constant 0 : index
    %39 = vector.load %arg10[%c0_22, %c0_23] : memref<16x4xf32, #tpu.memory_space<vmem>>, vector<16x4xf32>
    tpu.vector_store %arg10[%c0_22, %c0_23], %38 {strides = array<i32>} : memref<16x4xf32, #tpu.memory_space<vmem>>, vector<16x4xf32>,
    return
  }
  func.func @transform_0(%arg0: i32) -> (i32, i32) {
    %c0_i32 = arith.constant 0 : i32
    %c0_i32_0 = arith.constant 0 : i32
    return %arg0, %c0_i32 : i32, i32
  }
  func.func @transform_1(%arg0: i32) -> (i32, i32) {
    %c0_i32 = arith.constant 0 : i32
    %c0_i32_0 = arith.constant 0 : i32
    return %arg0, %c0_i32 : i32, i32
  }
  func.func @transform_2(%arg0: i32) -> (i32, i32) {
    %c0_i32 = arith.constant 0 : i32
    %c0_i32_0 = arith.constant 0 : i32
    return %arg0, %c0_i32 : i32, i32
  }
  func.func @transform_3(%arg0: i32) -> (i32, i32) {
    %c0_i32 = arith.constant 0 : i32
    %c0_i32_0 = arith.constant 0 : i32
    %c0_i32_1 = arith.constant 0 : i32
    return %c0_i32, %c0_i32_0 : i32, i32
  }
  func.func @transform_4(%arg0: i32) -> (i32, i32) {
    %c0_i32 = arith.constant 0 : i32
    %c0_i32_0 = arith.constant 0 : i32
    %c0_i32_1 = arith.constant 0 : i32
    return %c0_i32, %c0_i32_0 : i32, i32
  }
  func.func @transform_5(%arg0: i32) -> (i32, i32) {
    %c0_i32 = arith.constant 0 : i32
    %c0_i32_0 = arith.constant 0 : i32
    %c0_i32_1 = arith.constant 0 : i32
    return %c0_i32, %c0_i32_0 : i32, i32
  }
  func.func @transform_6(%arg0: i32) -> (i32, i32) {
    %c0_i32 = arith.constant 0 : i32
    %c0_i32_0 = arith.constant 0 : i32
    %c0_i32_1 = arith.constant 0 : i32
    return %c0_i32, %c0_i32_0 : i32, i32
  }
  func.func @transform_7(%arg0: i32) -> (i32, i32) {
    %c0_i32 = arith.constant 0 : i32
    %c0_i32_0 = arith.constant 0 : i32
    %c0_i32_1 = arith.constant 0 : i32
    return %c0_i32, %c0_i32_0 : i32, i32
  }
  func.func @transform_8(%arg0: i32) -> (i32, i32) {
    %c0_i32 = arith.constant 0 : i32
    %c0_i32_0 = arith.constant 0 : i32
    %c0_i32_1 = arith.constant 0 : i32
    return %c0_i32, %c0_i32_0 : i32, i32
  }
  func.func @transform_9(%arg0: i32) -> (i32, i32) {
    %c0_i32 = arith.constant 0 : i32
    %c0_i32_0 = arith.constant 0 : i32
    return %arg0, %c0_i32 : i32, i32
  }
}

</mosaic_0001>

<bundles_post_ra>
// kernel: tpu_custom_call.1
= control target key start
LH: loop header
LB: loop body
LE: loop exit
PB: predicated region body
PF: predicated region fallthrough
CT: control target
= control target key end

     0   :  { %vm68_vm0 = vcmask 1045504   ;;  %vm61_vm1 = vcmask 48128   ;;  %vm40_vm2 = vcmask 23552   ;;  %v55_v24 = vlaneseq  ;;  %s542_s3 = inlined_call_operand.vmem [shape: f32[6,32], index: 3, kind: input, shape index: {}]   ;;  %s543_s0 = inlined_call_operand.vmem [shape: f32[16,6], index: 0, kind: input, shape index: {}]   ;;  %s544_s1 = inlined_call_operand.vmem [shape: f32[16,3], index: 1, kind: input, shape index: {}]   ;;  %s545_s2 = inlined_call_operand.vmem [shape: f32[16,3], index: 2, kind: input, shape index: {}]   ;;  %s546_s5 = inlined_call_operand.vmem [shape: f32[32,32], index: 5, kind: input, shape index: {}]   ;;  %s547_s7 = inlined_call_operand.vmem [shape: f32[32,4], index: 7, kind: input, shape index: {}]   ;;  %s548_s4 = inlined_call_operand.vmem [shape: f32[3,32], index: 4, kind: input, shape index: {}]   ;;  %s549_s6 = inlined_call_operand.vmem [shape: f32[1,32], index: 6, kind: input, shape index: {}]   ;;  %s550_s8 = inlined_call_operand.vmem [shape: f32[1,4], index: 8, kind: input, shape index: {}]   ;;  %s551_s9 = inlined_call_operand.vmem [shape: f32[16,4], index: 9, kind: output, shape index: {}]  }
   0x1   :  { %v54_v0 = vld [vmem:[%s542_s3] sm:$0x3f]  ;;  %v53_v2 = vld [vmem:[%s543_s0 + $0x8] sm:$0xff]  ;;  %v165_v16 = vld [vmem:[%s546_s5 + $0x10] sm:$0xff]  ;;  %vm174_vm3 = vcmask 261120   ;;  %vm350_vm4 = vcmask 31744  }
   0x2   :  { %v52_v1 = vld [vmem:[%s543_s0] sm:$0xff]  ;;  %381 = vmatprep.subr.msk.mxu0 %vm68_vm0, %v54_v0  ;;  %v33_v5 = vld [vmem:[%s544_s1 + $0x8] sm:$0xff]  ;;  %v166_v17 = vld [vmem:[%s546_s5 + $0x18] sm:$0xff]  ;;  %v56_v25 = vshrl.u32 %v55_v24, 7 }
   0x3   :  { %383 = vmatprep.mubr.msk.f32.mxu0 %vm61_vm1, %v52_v1  ;;  %v32_v3 = vld [vmem:[%s544_s1] sm:$0xff]  ;;  %382 = vmatpush3.msk.msra.mxu0 %vm68_vm0, %v54_v0  ;;  %v35_v7 = vld [vmem:[%s545_s2 + $0x8] sm:$0xff]  ;;  %v412_v18 = vpack.c.bf16 %v166_v17, %v165_v16  ;;  %v260_v51 = vld [vmem:[%s547_s7 + $0x10] sm:$0xff] }
   0x4   :  { %v34_v4 = vld [vmem:[%s545_s2] sm:$0xff]  ;;  %384 = vmatmul.mubr.msk.f32.vlgmr.msra.gmra.mrb[0].mxu0 %vm61_vm1, %v53_v2  ;;  %v37_v8 = vsub.f32 %v33_v5, %v35_v7  ;;  %v164_v14 = vld [vmem:[%s546_s5 + $0x8] sm:$0xff]  ;;  %v57_v27 = vsub.s32 0, %v56_v25  ;;  %v149_v30 = vsub.s32 1, %v56_v25  ;;  %v157_v34 = vsub.s32 2, %v56_v25  ;;  %v261_v52 = vld [vmem:[%s547_s7 + $0x18] sm:$0xff] }
   0x5   :  { %v36_v6 = vsub.f32 %v32_v3, %v34_v4  ;;  %v163_v13 = vld [vmem:[%s546_s5] sm:$0xff]  ;;  %v259_v20 = vld [vmem:[%s547_s7 + $0x8] sm:$0xff]  ;;  %v420_v53 = vpack.c.bf16 %v261_v52, %v260_v51 }
   0x6   :  { %v39_v10 = vmul.f32 %v37_v8, %v37_v8  ;;  %v408_v15 = vpack.c.bf16 %v164_v14, %v163_v13  ;;  %v258_v19 = vld [vmem:[%s547_s7] sm:$0xff] }
   0x7   :  { %v38_v9 = vmul.f32 %v36_v6, %v36_v6  ;;  %v416_v21 = vpack.c.bf16 %v259_v20, %v258_v19  ;;  %v51_v29 = vld [vmem:[%s548_s4] sm:$0x7] }
   0x8   :  { %v44_v12 = vsel %vm40_vm2, %v39_v10, 0.0  ;;  %409 = vmatprep.subr.bf16.mxu1 %v408_v15  ;;  %v58_v33 = vrot.slane %v51_v29, %v57_v27  ;;  %v150_v35 = vrot.slane %v51_v29, %v149_v30  ;;  %v158_v42 = vrot.slane %v51_v29, %v157_v34  ;;  %v360_v54 = vld [vmem:[%s549_s6] ss:$0 sm:$0xff] }
   0x9   :  { %v41_v11 = vsel %vm40_vm2, %v38_v9, 0.0  ;;  %411 = vmatpush3.bf16.msra.mxu1 %v408_v15  ;;  %417 = vmatprep.subr.bf16.mxu0 %v416_v21  ;;  %v363_v61 = vld [vmem:[%s550_s8] ss:$0 sm:$0xff] }
   0xa   :  { %42 = vadd.xlane.f32.xlu0 %v41_v11  ;;  %413 = vmatprep.subr.bf16.mxu1 %v412_v18 }
   0xb   :  { %419 = vmatpush3.bf16.msra.mxu0 %v416_v21 }
   0xc   :  { %421 = vmatprep.subr.bf16.mxu0 %v420_v53 }
   0xd   :  { %415 = vmatpush3.bf16.msra.mxu1 %v412_v18 }
   0xe   :  { %45 = vadd.xlane.f32.xlu0 %v44_v12 }
   0xf   :  { %423 = vmatpush3.bf16.msra.mxu0 %v420_v53 }
  0x97   :  { %v43_v22 = vpop.xlane.xlu0 %42 }
  0x9b   :  { %v46_v23 = vpop.xlane.xlu0 %45 }
  0x9c   :  { %424 = vrsqrt.f32 %v46_v23 }
  0x9d   :  { %426 = vrsqrt.f32 %v43_v22 }
  0xa6   :  { %v425_v26 = vpop.eup %424 }
  0xa7   :  { %v427_v28 = vpop.eup %426  ;;  %v50_v31 = vmul.f32 %v425_v26, %v46_v23  ;;  %v152_v40 = vmul.f32 %v425_v26, %v150_v35 }
  0xa8   :  { %v49_v32 = vmul.f32 %v427_v28, %v43_v22  ;;  %v151_v44 = vmul.f32 %v427_v28, %v150_v35 }
  0xa9   :  { %v60_v36 = vmul.f32 %v58_v33, %v50_v31 }
  0xaa   :  { %v59_v38 = vmul.f32 %v58_v33, %v49_v32 }
  0xd7   :  { %v385_v37 = vpop.f32.mrb[0].mxu0 }
  0xd8   :  { %v144_v39 = vadd.f32 %v385_v37, %v60_v36  ;;  %v138_v41 = vpop.f32.mrb[1].mxu0 }
  0xd9   :  { %v139_v43 = vadd.f32 %v138_v41, %v59_v38 }
  0xda   :  { %v154_v45 = vadd.f32 %v152_v40, %v144_v39 }
  0xdb   :  { %v153_v46 = vadd.f32 %v151_v44, %v139_v43 }
  0xdc   :  { %v160_v47 = vadd.f32 %v158_v42, %v154_v45 }
  0xdd   :  { %v159_v48 = vadd.f32 %v158_v42, %v153_v46 }
  0xde   :  { %v162_v50 = vmax.f32 %v160_v47, 0.0 }
  0xdf   :  { %v161_v49 = vmax.f32 %v159_v48, 0.0 }
  0xe1   :  { %394 = vmatprep.mubr.msk.f32.mxu1 %vm174_vm3, %v161_v49 }
  0xe2   :  { %395 = vmatmul.mubr.msk.f32.vlgmr.msra.gmra.mrb[0].mxu1 %vm174_vm3, %v162_v50 }
 0x1b5   :  { %v396_v55 = vpop.f32.mrb[0].mxu1 }
 0x1b6   :  { %v253_v56 = vadd.f32 %v396_v55, %v360_v54  ;;  %v247_v57 = vpop.f32.mrb[1].mxu1 }
 0x1b7   :  { %v248_v58 = vadd.f32 %v360_v54, %v247_v57 }
 0x1b8   :  { %v257_v60 = vmax.f32 %v253_v56, 0.0 }
 0x1b9   :  { %v256_v59 = vmax.f32 %v248_v58, 0.0 }
 0x1bb   :  { %405 = vmatprep.mubr.msk.f32.mxu0 %vm174_vm3, %v256_v59 }
 0x1bc   :  { %406 = vmatmul.mubr.msk.f32.vlgmr.msra.gmra.mrb[2].mxu0 %vm174_vm3, %v257_v60 }
 0x28f   :  { %v407_v62 = vpop.f32.mrb[2].mxu0 }
 0x290   :  { %v347_v63 = vadd.f32 %v407_v62, %v363_v61  ;;  %v341_v0 = vpop.f32.mrb[3].mxu0 }
 0x291   :  { %v342_v1 = vadd.f32 %v363_v61, %v341_v0 }
 0x292   :  { %352 = vst.msk [vmem:[%s551_s9 + $0x8] sm:$0xff] %vm350_vm4, %v347_v63 }
 0x293   :  { %351 = vst.msk [vmem:[%s551_s9] sm:$0xff] %vm350_vm4, %v342_v1 }

</bundles_post_ra>
